<compile_context>
chip_gen: v7x
topology: tpu7x:2x2x1
jax: 0.10.0
libtpu: 0.0.40
codegen_flags: <defaults>
</compile_context>

<pallas_src>
import jax
import jax.numpy as jnp
from jax.experimental import pallas as pl
from jax.experimental.pallas import tpu as pltpu

_MIB = 1024 * 1024
# Conservative fallback limit: safe on v7x (64 MiB physical VMEM per TC).
_FALLBACK_VMEM_LIMIT = 48 * _MIB
# Per-tile byte target for the tiled path. ~6 MiB/tile => ~36 MiB of
# double-buffered pipeline footprint (2 inputs + 1 output, depth 2), inside
# the declared vmem_limit on every generation, and big enough to amortise the
# ~0.35 us per-grid-step overhead.
_TARGET_TILE_BYTES = 6 * _MIB


def _vmem_limit_bytes():
    """Generation-aware scoped-VMEM limit to declare on the pallas_call."""
    try:
        cap = int(pltpu.get_tpu_info().vmem_capacity_bytes)
    except Exception:  # not a TPU device / interpret mode / older jax
        return _FALLBACK_VMEM_LIMIT
    # Leave headroom for compiler-internal scratch; never exceed the smallest
    # per-TC physical VMEM (64 MiB on v7x) so the declared limit is always
    # accepted regardless of how capacity is reported.
    return min(max(cap * 3 // 4, 32 * _MIB), 64 * _MIB)


def _sublane_multiple(dtype):
    """Native sublane packing multiple: 8 (f32), 16 (bf16), 32 (int8/fp8)."""
    itemsize = jnp.dtype(dtype).itemsize
    return max(8, 32 // max(itemsize, 1))


def _attention_kernel(w_ref, a_ref, b_ref, o_ref):
    # Two scalar reads from SMEM, splatted by the VPU; one fused elementwise
    # pass over the VMEM tile.
    w0 = w_ref[0]
    w1 = w_ref[1]
    o_ref[...] = (w0 * a_ref[...] + w1 * b_ref[...]).astype(o_ref.dtype)


def attention_model_forward(attention_weights, loss_A, loss_B, *,
                            block_rows=None, block_cols=None):
    """Pallas equivalent of AttentionModel.forward(loss_A, loss_B)."""
    assert loss_A.shape == loss_B.shape, "loss_A / loss_B shape mismatch"
    assert loss_A.dtype == loss_B.dtype, "loss_A / loss_B dtype mismatch"

    orig_shape = loss_A.shape
    # Flatten arbitrary rank to 2-D, keeping the last dim lane-major.
    if loss_A.ndim == 0:
        a2d, b2d = loss_A.reshape(1, 1), loss_B.reshape(1, 1)
    elif loss_A.ndim == 1:
        a2d, b2d = loss_A.reshape(1, -1), loss_B.reshape(1, -1)
    else:
        a2d = loss_A.reshape(-1, orig_shape[-1])
        b2d = loss_B.reshape(-1, orig_shape[-1])

    M, N = a2d.shape
    dtype = a2d.dtype
    itemsize = jnp.dtype(dtype).itemsize
    total_bytes = 3 * M * N * itemsize

    vmem_limit = _vmem_limit_bytes()
    w = jnp.asarray(attention_weights).reshape((2,)).astype(jnp.float32)
    out_shape = jax.ShapeDtypeStruct((M, N), dtype)

    if block_rows is None and block_cols is None and total_bytes <= vmem_limit // 2:
        # Single-shot path: no grid, no index maps, whole arrays resident in
        # VMEM — zero pipeline machinery for small/medium problems.
        out2d = pl.pallas_call(
            _attention_kernel,
            out_shape=out_shape,
            in_specs=[
                pl.BlockSpec(memory_space=pltpu.SMEM),   # attention weights (2,)
                pl.BlockSpec(memory_space=pltpu.VMEM),   # loss_A
                pl.BlockSpec(memory_space=pltpu.VMEM),   # loss_B
            ],
            out_specs=pl.BlockSpec(memory_space=pltpu.VMEM),
            compiler_params=pltpu.CompilerParams(vmem_limit_bytes=vmem_limit),
        )(w, a2d, b2d)
        return out2d.reshape(orig_shape)

    # Tiled path: 2-D grid (rows x cols) with large lane-dense tiles.
    sublane = _sublane_multiple(dtype)

    # Column tile: full N when a sublane-group of full rows fits the byte
    # budget, otherwise the largest multiple of 128 that keeps tiles on budget.
    if block_cols is not None:
        tn = int(min(N, block_cols))
    elif N * itemsize * sublane <= _TARGET_TILE_BYTES:
        tn = N
    else:
        tn = (_TARGET_TILE_BYTES // (sublane * itemsize)) // 128 * 128
        tn = int(min(N, max(128, tn)))
    if tn < N:  # keep unmasked stores: multiple of 128 when not full-width
        tn = int(min(N, max(128, (tn // 128) * 128)))

    # Row tile: fill the byte budget, rounded to the dtype-native sublane
    # multiple (8 f32 / 16 bf16 / 32 int8-fp8).
    if block_rows is not None:
        tm = int(min(M, block_rows))
    else:
        rows = _TARGET_TILE_BYTES // max(tn * itemsize, 1)
        tm = int(min(M, max(sublane, (rows // sublane) * sublane)))
    if tm < M:
        tm = int(min(M, max(sublane, (tm // sublane) * sublane)))

    grid = (pl.cdiv(M, tm), pl.cdiv(N, tn))

    out2d = pl.pallas_call(
        _attention_kernel,
        out_shape=out_shape,
        grid=grid,
        in_specs=[
            pl.BlockSpec(memory_space=pltpu.SMEM),            # weights (2,)
            pl.BlockSpec((tm, tn), lambda i, j: (i, j)),      # loss_A tile
            pl.BlockSpec((tm, tn), lambda i, j: (i, j)),      # loss_B tile
        ],
        out_specs=pl.BlockSpec((tm, tn), lambda i, j: (i, j)),
        compiler_params=pltpu.CompilerParams(
            dimension_semantics=("parallel", "parallel"),     # both TCs on v7x
            vmem_limit_bytes=vmem_limit,
        ),
    )(w, a2d, b2d)
    return out2d.reshape(orig_shape)


if __name__ == "__main__":
    # Deterministic parameter init matching torch.nn.Parameter([0.5, 0.5]).
    attention_weights = jnp.array([0.5, 0.5], dtype=jnp.float32)

    key = jax.random.PRNGKey(0)
    k = jax.random.split(key, 6)

    def ref_fn(wts, a, b):
        return (wts[0] * a.astype(jnp.float32)
                + wts[1] * b.astype(jnp.float32)).astype(a.dtype)

    # 1) Small f32 case (one vreg per input) — gridless single-shot path.
    loss_A = jax.random.normal(k[0], (8, 128), dtype=jnp.float32)
    loss_B = jax.random.normal(k[1], (8, 128), dtype=jnp.float32)
    out = jax.block_until_ready(
        attention_model_forward(attention_weights, loss_A, loss_B))
    assert jnp.allclose(out, ref_fn(attention_weights, loss_A, loss_B),
                        atol=1e-6, rtol=1e-6), "mismatch (single-shot path)"

    # 2) Forced 2-D tiled grid path (row + column tiling, ragged edge blocks).
    loss_A2 = jax.random.normal(k[2], (48, 384), dtype=jnp.float32)
    loss_B2 = jax.random.normal(k[3], (48, 384), dtype=jnp.float32)
    out2 = jax.block_until_ready(
        attention_model_forward(attention_weights, loss_A2, loss_B2,
                                block_rows=16, block_cols=256))
    assert jnp.allclose(out2, ref_fn(attention_weights, loss_A2, loss_B2),
                        atol=1e-6, rtol=1e-6), "mismatch (tiled 2-D grid path)"

    # 3) bf16, 3-D input (rank-flattening path), single-shot.
    loss_A3 = jax.random.normal(k[4], (2, 16, 128), dtype=jnp.bfloat16)
    loss_B3 = jax.random.normal(k[5], (2, 16, 128), dtype=jnp.bfloat16)
    out3 = jax.block_until_ready(
        attention_model_forward(attention_weights, loss_A3, loss_B3))
    assert out3.shape == loss_A3.shape and out3.dtype == loss_A3.dtype
    assert jnp.allclose(out3.astype(jnp.float32),
                        ref_fn(attention_weights, loss_A3, loss_B3).astype(jnp.float32),
                        atol=1e-2, rtol=1e-2), "mismatch (bf16 / 3-D path)"

    print("KERNEL_OK")
</pallas_src>

<mosaic_0001>
module attributes {stable_mosaic.version = 11 : i64} {
  func.func @_attention_kernel(%arg0: memref<2xf32, #tpu.memory_space<smem>>, %arg1: memref<8x128xf32, #tpu.memory_space<vmem>>, %arg2: memref<8x128xf32, #tpu.memory_space<vmem>>, %arg3: memref<8x128xf32, #tpu.memory_space<vmem>>) attributes {dimension_semantics = [], scalar_prefetch = 0 : i64, scratch_operands = 0 : i64, tpu.core_type = #tpu.core_type<tc>} {
    %c0 = arith.constant 0 : index
    %0 = memref.load %arg0[%c0] : memref<2xf32, #tpu.memory_space<smem>>
    %c1 = arith.constant 1 : index
    %1 = memref.load %arg0[%c1] : memref<2xf32, #tpu.memory_space<smem>>
    %c0_0 = arith.constant 0 : index
    %c0_1 = arith.constant 0 : index
    %2 = vector.load %arg1[%c0_0, %c0_1] : memref<8x128xf32, #tpu.memory_space<vmem>>, vector<8x128xf32>
    %3 = vector.broadcast %0 : f32 to vector<8x128xf32>
    %4 = arith.mulf %3, %2 : vector<8x128xf32>
    %c0_2 = arith.constant 0 : index
    %c0_3 = arith.constant 0 : index
    %5 = vector.load %arg2[%c0_2, %c0_3] : memref<8x128xf32, #tpu.memory_space<vmem>>, vector<8x128xf32>
    %6 = vector.broadcast %1 : f32 to vector<8x128xf32>
    %7 = arith.mulf %6, %5 : vector<8x128xf32>
    %8 = arith.addf %4, %7 : vector<8x128xf32>
    %c0_4 = arith.constant 0 : index
    %c0_5 = arith.constant 0 : index
    %9 = vector.load %arg3[%c0_4, %c0_5] : memref<8x128xf32, #tpu.memory_space<vmem>>, vector<8x128xf32>
    tpu.vector_store %arg3[%c0_4, %c0_5], %8 {strides = array<i32>} : memref<8x128xf32, #tpu.memory_space<vmem>>, vector<8x128xf32>,
    return
  }
}

</mosaic_0001>

<bundles_post_ra>
// kernel: tpu_custom_call.1
= control target key start
LH: loop header
LB: loop body
LE: loop exit
PB: predicated region body
PF: predicated region fallthrough
CT: control target
= control target key end

     0   :  { %8 = vsyncpa [#allocation5], 0  ;;  %s238_s0 = inlined_call_operand.hbm [shape: f32[2], index: 0, kind: input, shape index: {}]   ;;  %s239_s1 = inlined_call_operand.hbm [shape: f32[8,128], index: 1, kind: input, shape index: {}]   ;;  %s240_s2 = inlined_call_operand.hbm [shape: f32[8,128], index: 2, kind: input, shape index: {}]   ;;  %s241_s3 = inlined_call_operand.hbm [shape: f32[8,128], index: 3, kind: output, shape index: {}]  }
   0x1   :  { %9 = vsyncpa [#allocation3], 0 }
   0x2   :  { %10 = vsyncpa [#allocation8], 0 }
   0x3   :  { %11 = vsyncpa [#allocation4], 0  ;;  %s82_s14 = scalar_lea.hbm %s238_s0, 16 }
   0x4   :  { %p83_p0 = scmp.ne.s32.totalorder %s238_s0, %s82_s14  ;;  %p86_p1 = scmp.lt.u32.totalorder %s82_s14, %s238_s0 }
   0x6   :  { %p88_p2 = pnand %p86_p1, %p83_p0 }
   0x8   :  { %91 = shalt.err (!%p88_p2)
}
   0x9   :  { %s166_s19 = smov [#allocation2]   ;;  %s167_s22 = smov [#allocation6]  }
   0xa   :  { %19 = dma.hbm_to_smem %s238_s0, 16, %s166_s19, [#allocation5]  }
   0xb   :  { %s26_s23 = sshll.u32 %s167_s22, 4  ;;  %s168_s24 = smov [#allocation7]   ;;  %s27_s23 = int_to_ptr.vmem [resolvable:$true] %s26_s23 }
   0xc   :  { %s36_s25 = sshll.u32 %s168_s24, 4  ;;  %s92_s28 = scalar_lea.hbm %s239_s1, 128  ;;  %s37_s25 = int_to_ptr.vmem [resolvable:$true] %s36_s25 }
   0xd   :  { %p93_p3 = scmp.ne.s32.totalorder %s239_s1, %s92_s28  ;;  %p96_p4 = scmp.lt.u32.totalorder %s92_s28, %s239_s1 }
   0xf   :  { %p98_p5 = pnand %p96_p4, %p93_p3 }
  0x11   :  { %101 = shalt.err (!%p98_p5)
}
  0x12   :  { %s102_s0 = scalar_lea.vmem %s27_s23, 128  ;;  %p107_p7 = scmp.lt.s32.totalorder %s27_s23, %s27_s23 }
  0x13   :  { %p103_p6 = scmp.ne.s32.totalorder %s27_s23, %s102_s0  ;;  %p108_p8 = scmp.lt.s32.totalorder %s102_s0, %s102_s0 }
  0x15   :  { %p109_p9 = por %p108_p8, %p107_p7 }
  0x17   :  { %p110_p10 = pnand %p109_p9, %p103_p6 }
  0x19   :  { %113 = shalt.err (!%p110_p10)
}
  0x1a   :  { %29 = dma.hbm_to_vmem [thread:$0]  %s239_s1, 128, %s27_s23, [#allocation3]  }
  0x1b   :  { %s114_s10 = scalar_lea.hbm %s240_s2, 128 }
  0x1c   :  { %p115_p11 = scmp.ne.s32.totalorder %s240_s2, %s114_s10  ;;  %p118_p12 = scmp.lt.u32.totalorder %s114_s10, %s240_s2 }
  0x1e   :  { %p120_p13 = pnand %p118_p12, %p115_p11 }
  0x20   :  { %123 = shalt.err (!%p120_p13)
}
  0x21   :  { %s124_s15 = scalar_lea.vmem %s37_s25, 128  ;;  %p129_p1 = scmp.lt.s32.totalorder %s37_s25, %s37_s25 }
  0x22   :  { %p125_p0 = scmp.ne.s32.totalorder %s37_s25, %s124_s15  ;;  %p130_p2 = scmp.lt.s32.totalorder %s124_s15, %s124_s15 }
  0x24   :  { %p131_p3 = por %p130_p2, %p129_p1 }
  0x26   :  { %p132_p4 = pnand %p131_p3, %p125_p0 }
  0x28   :  { %135 = shalt.err (!%p132_p4)
}
  0x29   :  { %39 = dma.hbm_to_vmem [thread:$0]  %s240_s2, 128, %s37_s25, [#allocation8]  }
  0x2a   :  { %158 = dma.done.wait [#allocation5], 16  }
  0x2b   :  { %159 = vsyncadd [#allocation5], 4294967280 }
  0x2c   :  { %160 = dma.done.wait [#allocation3], 128  }
  0x2d   :  { %161 = vsyncadd [#allocation3], 4294967168 }
  0x2e   :  { %162 = dma.done.wait [#allocation8], 128  }
  0x2f   :  { %163 = vsyncadd [#allocation8], 4294967168 }
  0x30   :  { %49 = sfence }
  0x31   :  { %s50_s17 = sld [smem:[#allocation2]]  ;;  %s77_s18 = sld [smem:[#allocation2 + $0x1]]  ;;  %v52_v0 = vld [vmem:[#allocation6] sm:$0xff]  ;;  %v55_v1 = vld [vmem:[#allocation7] sm:$0xff] }
  0x32   :  { %s169_s19 = smov [#allocation9]  }
  0x33   :  { %s66_s20 = sshll.u32 %s169_s19, 4  ;;  %s67_s20 = int_to_ptr.vmem [resolvable:$true] %s66_s20 }
  0x34   :  { %s136_s2 = scalar_lea.vmem %s67_s20, 128  ;;  %p141_p6 = scmp.lt.s32.totalorder %s67_s20, %s67_s20 }
  0x35   :  { %p137_p5 = scmp.ne.s32.totalorder %s67_s20, %s136_s2  ;;  %p142_p7 = scmp.lt.s32.totalorder %s136_s2, %s136_s2 }
  0x37   :  { %v53_v2 = vstv %s50_s17  ;;  %v56_v3 = vstv %s77_s18  ;;  %p143_p8 = por %p142_p7, %p141_p6 }
  0x38   :  { %v54_v4 = vmul.f32 %v53_v2, %v52_v0  ;;  %v57_v5 = vmul.f32 %v56_v3, %v55_v1 }
  0x39   :  { %p144_p9 = pnand %p143_p8, %p137_p5 }
  0x3a   :  { %v58_v6 = vadd.f32 %v57_v5, %v54_v4 }
  0x3c   :  { %59 = vst [vmem:[#allocation9] sm:$0xff] %v58_v6 }
  0x3d   :  { %147 = shalt.err (!%p144_p9)
}
  0x3e   :  { %s148_s23 = scalar_lea.hbm %s241_s3, 128 }
  0x3f   :  { %p149_p10 = scmp.ne.s32.totalorder %s241_s3, %s148_s23  ;;  %p152_p11 = scmp.lt.u32.totalorder %s148_s23, %s241_s3 }
  0x41   :  { %p154_p12 = pnand %p152_p11, %p149_p10 }
  0x43   :  { %157 = shalt.err (!%p154_p12)
}
  0x44   :  { %69 = dma.vmem_to_hbm [thread:$0]  %s67_s20, 128, %s241_s3, [#allocation4]  }
  0x45   :  { %164 = dma.done.wait [#allocation4], 128  }
  0x46   :  { %165 = vsyncadd [#allocation4], 4294967168 }
  0x47   :  { %73 = vsyncpa [#allocation3], 1 }
  0x48   :  { %74 = vsyncpa [#allocation8], 1 }
  0x49   :  { %75 = vsyncpa [#allocation4], 1 }
  0x4a   :  { %76 = vsyncpa [#allocation5], 1 }

</bundles_post_ra>
